<compile_context>
chip_gen: v5e
topology: v5e:2x2
jax: 0.10.0
libtpu: 0.0.40
codegen_flags: <defaults>
</compile_context>

<pallas_src>
import functools

import jax
import jax.numpy as jnp
from jax.experimental import pallas as pl
from jax.experimental.pallas import tpu as pltpu


def _fused_gcn_kernel(x_ref, w1_ref, wd_ref, b_ref, o_ref, *,
                      n_pad, n_valid, n_blocks, hidden, bb, mxu_dtype,
                      unroll_layers):
    # x_ref  : (bb * n_pad, hidden)        bb batch elements, flattened rows
    # w1_ref : (n_blocks, hidden, hidden)  W1^T  (acts on x_j)
    # wd_ref : (n_blocks, hidden, hidden)  (W2 - W1)^T  (acts on x_i)
    # b_ref  : (n_blocks, 1, hidden)       conv bias
    # o_ref  : (bb * n_pad, hidden)
    rows = bb * n_pad
    x0 = x_ref[...].astype(jnp.float32)

    if n_valid < n_pad:
        # Mask padded proposal rows so they never win the max over j.
        valid = jax.lax.broadcasted_iota(jnp.int32, (bb, n_pad, 1), 1) < n_valid
    else:
        valid = None

    def layer(l, x):
        xm = x.astype(mxu_dtype)
        a = jnp.dot(xm, w1_ref[l], preferred_element_type=jnp.float32)  # (rows, C)
        d = jnp.dot(xm, wd_ref[l], preferred_element_type=jnp.float32)  # (rows, C)
        a3 = a.reshape(bb, n_pad, hidden)        # sublane-aligned (n_pad % 8 == 0)
        d3 = d.reshape(bb, n_pad, hidden)
        if valid is not None:
            a3 = jnp.where(valid, a3, -jnp.inf)
        # max_j ReLU(.) == ReLU(max_j .)  (ReLU is monotone); fold bias in once.
        amax_b = jnp.max(a3, axis=1, keepdims=True) + b_ref[l]          # (bb, 1, C)
        y3 = jnp.maximum(amax_b + d3, 0.0)
        return y3.reshape(rows, hidden)

    if unroll_layers:
        x = x0
        for l in range(n_blocks):
            x = layer(l, x)
    else:
        x = jax.lax.fori_loop(0, n_blocks, layer, x0)

    o_ref[...] = x.astype(o_ref.dtype)


def _prepare_params(params, mxu_dtype):
    """One-time prep: per-block W1^T, (W2-W1)^T, bias (hoisted out of the kernel)."""
    w1s, wds, bs = [], [], []
    for (w, b) in params:                 # w: (C, 2C) conv weight, b: (C,)
        c = w.shape[0]
        w1t = jnp.transpose(w[:, :c])     # acts on (x_j - x_i)
        w2t = jnp.transpose(w[:, c:])     # acts on x_i
        w1s.append(w1t)
        wds.append(w2t - w1t)
        bs.append(b.reshape(1, c))
    w1 = jnp.stack(w1s, axis=0).astype(mxu_dtype)
    wd = jnp.stack(wds, axis=0).astype(mxu_dtype)
    bias = jnp.stack(bs, axis=0).astype(jnp.float32)
    return w1, wd, bias


def _vmem_policy():
    """(per-step tile budget, explicit scoped-VMEM limit) from physical VMEM."""
    phys = 64 << 20                       # conservative fallback (v7x physical)
    try:
        phys = int(getattr(pltpu.get_tpu_info(), "vmem_capacity_bytes", phys))
    except Exception:
        pass
    budget = phys // 2                    # leave headroom for compiler scratch
    limit = min(phys * 3 // 4, 96 << 20)
    return budget, int(limit)


def _num_parallel_cores():
    """2 on chips whose TensorCores share one Pallas grid (v4/v5p/v7x), else 1."""
    try:
        kind = jax.devices()[0].device_kind.lower()
    except Exception:
        return 1
    return 2 if any(t in kind for t in ("v4", "v5p", "v7", "7x", "tpu7")) else 1


def _pick_batch_block(batch, n_pad, hidden, n_blocks, w_itemsize,
                      vmem_budget, num_parallel):
    """Largest batch chunk whose tiles fit the VMEM budget; on 2-TC chips prefer a
    split that keeps the grid a multiple of the core count."""
    weight_bytes = 2 * (2 * n_blocks * hidden * hidden * w_itemsize
                        + n_blocks * hidden * 4)

    def fits(bb):
        act = bb * n_pad * hidden * 4
        # 2x double-buffered input block + 2x output block + ~6 activation-sized
        # live temporaries inside the layer loop (x, a, d, result, relayout slack).
        return act * 10 + weight_bytes <= vmem_budget

    feasible = [bb for bb in range(batch, 0, -1) if batch % bb == 0 and fits(bb)]
    if not feasible:
        return 1                          # smallest legal block; may spill but runs
    if num_parallel > 1 and batch >= num_parallel:
        for bb in feasible:               # descending -> largest bb with >=2k steps
            if (batch // bb) % num_parallel == 0:
                return bb
    return feasible[0]                    # single-TC: largest feasible (grid may be 1)


def adaptive_prop_interaction(prop_feature, params, *, batch_block=None,
                              mxu_dtype=jnp.bfloat16):
    """prop_feature: (B, N, C). Applies len(params) fused AdaptiveGCN blocks."""
    B, N, C = prop_feature.shape
    n_blocks = len(params)
    w1, wd, bias = _prepare_params(params, mxu_dtype)

    # Sublane-align the proposal axis so the in-kernel (rows, C)->(bb, N, C)
    # reshape is tile-aligned; padded rows are masked out of the max in-kernel.
    n_pad = ((N + 7) // 8) * 8
    x = prop_feature
    if n_pad != N:
        x = jnp.pad(x, ((0, 0), (0, n_pad - N), (0, 0)))
    x_flat = x.reshape(B * n_pad, C)

    vmem_budget, vmem_limit = _vmem_policy()
    if batch_block is None:
        bb = _pick_batch_block(B, n_pad, C, n_blocks, w1.dtype.itemsize,
                               vmem_budget, _num_parallel_cores())
    else:
        bb = int(batch_block)
    assert B % bb == 0, "batch_block must divide the batch size"
    assert (bb * n_pad) % 8 == 0
    grid_b = B // bb
    rows = bb * n_pad

    unroll_layers = n_blocks <= 4

    kernel = functools.partial(
        _fused_gcn_kernel, n_pad=n_pad, n_valid=N, n_blocks=n_blocks,
        hidden=C, bb=bb, mxu_dtype=mxu_dtype, unroll_layers=unroll_layers)

    flops = 2 * (B * n_pad) * C * (2 * C) * n_blocks
    bytes_accessed = (2 * B * n_pad * C * prop_feature.dtype.itemsize  # x in + out
                      + 2 * n_blocks * C * C * w1.dtype.itemsize       # weights
                      + n_blocks * C * 4)                              # bias
    cost = pl.CostEstimate(flops=int(flops), transcendentals=0,
                           bytes_accessed=int(bytes_accessed))

    out_flat = pl.pallas_call(
        kernel,
        out_shape=jax.ShapeDtypeStruct((B * n_pad, C), prop_feature.dtype),
        grid=(grid_b,),
        in_specs=[
            pl.BlockSpec((rows, C), lambda i: (i, 0)),
            pl.BlockSpec((n_blocks, C, C), lambda i: (0, 0, 0)),
            pl.BlockSpec((n_blocks, C, C), lambda i: (0, 0, 0)),
            pl.BlockSpec((n_blocks, 1, C), lambda i: (0, 0, 0)),
        ],
        out_specs=pl.BlockSpec((rows, C), lambda i: (i, 0)),
        compiler_params=pltpu.CompilerParams(
            dimension_semantics=("parallel",),
            vmem_limit_bytes=vmem_limit),
        cost_estimate=cost,
        input_output_aliases={0: 0},      # x_flat is dead after the call
    )(x_flat, w1, wd, bias)

    out = out_flat.reshape(B, n_pad, C)
    if n_pad != N:
        out = out[:, :N, :]
    return out


def init_params(key, hidden_size, num_blocks):
    """Deterministic Conv2d(2*hidden, hidden, 1) params per block (PyTorch-style init)."""
    params = []
    for i in range(num_blocks):
        kw, kb = jax.random.split(jax.random.fold_in(key, i))
        fan_in = 2 * hidden_size
        bound = 1.0 / (fan_in ** 0.5)
        w = jax.random.uniform(kw, (hidden_size, 2 * hidden_size),
                               jnp.float32, -bound, bound)
        b = jax.random.uniform(kb, (hidden_size,), jnp.float32, -bound, bound)
        params.append((w, b))
    return params


def _reference(prop_feature, params):
    """Pure-JAX mirror of the PyTorch module (explicit (N,N,C) form) for validation."""
    x = prop_feature                                           # (B, N, C)
    for (w, b) in params:
        B, N, C = x.shape
        diff = x[:, None, :, :] - x[:, :, None, :]             # [b,i,j,:] = x_j - x_i
        self_feat = jnp.broadcast_to(x[:, :, None, :], (B, N, N, C))
        feat = jnp.concatenate([diff, self_feat], axis=3)      # (B, N, N, 2C)
        pre = jnp.einsum('bijk,ck->bijc', feat, w) + b[None, None, None, :]
        x = jnp.max(jax.nn.relu(pre), axis=2)                  # max over j
    return x


if __name__ == "__main__":
    key = jax.random.PRNGKey(0)
    kx, kp = jax.random.split(key)

    # Config 1: demo shapes (unrolled-layer path), f32 and bf16 MXU variants.
    B, N, C = 2, 8, 32          # batch, num proposals, gcn.hidden_size
    num_blocks = 2              # config.gcn.num_blocks
    prop_feature = jax.random.normal(kx, (B, N, C), jnp.float32)
    params = init_params(kp, C, num_blocks)

    run_f32 = jax.jit(functools.partial(adaptive_prop_interaction,
                                        mxu_dtype=jnp.float32))
    run_bf16 = jax.jit(adaptive_prop_interaction)   # default: bf16 MXU operands

    ref1 = jax.block_until_ready(_reference(prop_feature, params))

    out_f32 = jax.block_until_ready(run_f32(prop_feature, params))
    assert out_f32.shape == (B, N, C) and out_f32.dtype == jnp.float32
    assert jnp.allclose(out_f32, ref1, rtol=1e-4, atol=1e-5), \
        float(jnp.max(jnp.abs(out_f32 - ref1)))

    out_bf16 = jax.block_until_ready(run_bf16(prop_feature, params))
    assert jnp.allclose(out_bf16, ref1, rtol=5e-2, atol=5e-2), \
        float(jnp.max(jnp.abs(out_bf16 - ref1)))

    # Config 2: more blocks (lax.fori_loop layer path), N not a multiple of 8
    # (padding + in-kernel masking), batch split across >1 grid step.
    B2, N2, C2, L2 = 4, 12, 32, 6
    x2 = jax.random.normal(jax.random.fold_in(kx, 1), (B2, N2, C2), jnp.float32)
    p2 = init_params(jax.random.fold_in(kp, 1), C2, L2)
    run2 = jax.jit(functools.partial(adaptive_prop_interaction,
                                     batch_block=2, mxu_dtype=jnp.float32))
    out2 = jax.block_until_ready(run2(x2, p2))
    ref2 = jax.block_until_ready(_reference(x2, p2))
    assert out2.shape == (B2, N2, C2)
    assert jnp.allclose(out2, ref2, rtol=1e-4, atol=1e-5), \
        float(jnp.max(jnp.abs(out2 - ref2)))

    print("KERNEL_OK")
</pallas_src>

<mosaic_0001>
module attributes {stable_mosaic.version = 11 : i64} {
  func.func @_fused_gcn_kernel(%arg0: i32, %arg1: memref<16x32xf32, #tpu.memory_space<vmem>>, %arg2: memref<2x32x32xf32, #tpu.memory_space<vmem>>, %arg3: memref<2x32x32xf32, #tpu.memory_space<vmem>>, %arg4: memref<2x1x32xf32, #tpu.memory_space<vmem>>, %arg5: memref<16x32xf32, #tpu.memory_space<vmem>>) attributes {dimension_semantics = [#tpu.dimension_semantics<parallel>], iteration_bounds = array<i64: 1>, scalar_prefetch = 0 : i64, scratch_operands = 0 : i64, tpu.core_type = #tpu.core_type<tc>, window_params = [{transform_indices = @transform_0, window_bounds = array<i64: 16, 32>}, {pipeline_mode = #tpu.pipeline_mode<synchronous>, transform_indices = @transform_1, window_bounds = array<i64: 2, 32, 32>}, {pipeline_mode = #tpu.pipeline_mode<synchronous>, transform_indices = @transform_2, window_bounds = array<i64: 2, 32, 32>}, {pipeline_mode = #tpu.pipeline_mode<synchronous>, transform_indices = @transform_3, window_bounds = array<i64: 2, 1, 32>}, {transform_indices = @transform_4, window_bounds = array<i64: 16, 32>}]} {
    %c0 = arith.constant 0 : index
    %c0_0 = arith.constant 0 : index
    %0 = vector.load %arg1[%c0, %c0_0] : memref<16x32xf32, #tpu.memory_space<vmem>>, vector<16x32xf32>
    %c0_1 = arith.constant 0 : index
    %c0_2 = arith.constant 0 : index
    %c0_3 = arith.constant 0 : index
    %1 = vector.load %arg2[%c0_1, %c0_2, %c0_3] : memref<2x32x32xf32, #tpu.memory_space<vmem>>, vector<1x32x32xf32>
    %2 = vector.shape_cast %1 : vector<1x32x32xf32> to vector<32x32xf32>
    %cst = arith.constant dense<0.000000e+00> : vector<16x32xf32>
    %3 = tpu.matmul %0, %2, %cst {dimension_numbers = #tpu.dot_dimension_numbers<[1], [0], [0], [1], [0, 0, 1, 1], [], []>} : vector<16x32xf32>, vector<32x32xf32>, vector<16x32xf32> -> vector<16x32xf32>
    %c0_4 = arith.constant 0 : index
    %c0_5 = arith.constant 0 : index
    %c0_6 = arith.constant 0 : index
    %4 = vector.load %arg3[%c0_4, %c0_5, %c0_6] : memref<2x32x32xf32, #tpu.memory_space<vmem>>, vector<1x32x32xf32>
    %5 = vector.shape_cast %4 : vector<1x32x32xf32> to vector<32x32xf32>
    %cst_7 = arith.constant dense<0.000000e+00> : vector<16x32xf32>
    %6 = tpu.matmul %0, %5, %cst_7 {dimension_numbers = #tpu.dot_dimension_numbers<[1], [0], [0], [1], [0, 0, 1, 1], [], []>} : vector<16x32xf32>, vector<32x32xf32>, vector<16x32xf32> -> vector<16x32xf32>
    %7 = vector.shape_cast %3 : vector<16x32xf32> to vector<2x8x32xf32>
    %8 = vector.shape_cast %6 : vector<16x32xf32> to vector<2x8x32xf32>
    %cst_8 = arith.constant dense<0xFF800000> : vector<2x32xf32>
    %9 = vector.multi_reduction <maximumf>, %7, %cst_8 [1] : vector<2x8x32xf32> to vector<2x32xf32>
    %10 = vector.shape_cast %9 : vector<2x32xf32> to vector<2x1x32xf32>
    %c0_9 = arith.constant 0 : index
    %c0_10 = arith.constant 0 : index
    %c0_11 = arith.constant 0 : index
    %11 = vector.load %arg4[%c0_9, %c0_10, %c0_11] : memref<2x1x32xf32, #tpu.memory_space<vmem>>, vector<1x1x32xf32>
    %12 = vector.shape_cast %11 : vector<1x1x32xf32> to vector<1x32xf32>
    %13 = vector.shape_cast %12 : vector<1x32xf32> to vector<1x1x32xf32>
    %14 = vector.broadcast %13 : vector<1x1x32xf32> to vector<2x1x32xf32>
    %15 = arith.addf %10, %14 : vector<2x1x32xf32>
    %16 = vector.broadcast %15 : vector<2x1x32xf32> to vector<2x8x32xf32>
    %17 = arith.addf %16, %8 : vector<2x8x32xf32>
    %cst_12 = arith.constant 0.000000e+00 : f32
    %18 = vector.broadcast %cst_12 : f32 to vector<2x8x32xf32>
    %19 = arith.maximumf %17, %18 : vector<2x8x32xf32>
    %20 = vector.shape_cast %19 : vector<2x8x32xf32> to vector<16x32xf32>
    %c1 = arith.constant 1 : index
    %c0_13 = arith.constant 0 : index
    %c0_14 = arith.constant 0 : index
    %21 = vector.load %arg2[%c1, %c0_13, %c0_14] : memref<2x32x32xf32, #tpu.memory_space<vmem>>, vector<1x32x32xf32>
    %22 = vector.shape_cast %21 : vector<1x32x32xf32> to vector<32x32xf32>
    %cst_15 = arith.constant dense<0.000000e+00> : vector<16x32xf32>
    %23 = tpu.matmul %20, %22, %cst_15 {dimension_numbers = #tpu.dot_dimension_numbers<[1], [0], [0], [1], [0, 0, 1, 1], [], []>} : vector<16x32xf32>, vector<32x32xf32>, vector<16x32xf32> -> vector<16x32xf32>
    %c1_16 = arith.constant 1 : index
    %c0_17 = arith.constant 0 : index
    %c0_18 = arith.constant 0 : index
    %24 = vector.load %arg3[%c1_16, %c0_17, %c0_18] : memref<2x32x32xf32, #tpu.memory_space<vmem>>, vector<1x32x32xf32>
    %25 = vector.shape_cast %24 : vector<1x32x32xf32> to vector<32x32xf32>
    %cst_19 = arith.constant dense<0.000000e+00> : vector<16x32xf32>
    %26 = tpu.matmul %20, %25, %cst_19 {dimension_numbers = #tpu.dot_dimension_numbers<[1], [0], [0], [1], [0, 0, 1, 1], [], []>} : vector<16x32xf32>, vector<32x32xf32>, vector<16x32xf32> -> vector<16x32xf32>
    %27 = vector.shape_cast %23 : vector<16x32xf32> to vector<2x8x32xf32>
    %28 = vector.shape_cast %26 : vector<16x32xf32> to vector<2x8x32xf32>
    %cst_20 = arith.constant dense<0xFF800000> : vector<2x32xf32>
    %29 = vector.multi_reduction <maximumf>, %27, %cst_20 [1] : vector<2x8x32xf32> to vector<2x32xf32>
    %30 = vector.shape_cast %29 : vector<2x32xf32> to vector<2x1x32xf32>
    %c1_21 = arith.constant 1 : index
    %c0_22 = arith.constant 0 : index
    %c0_23 = arith.constant 0 : index
    %31 = vector.load %arg4[%c1_21, %c0_22, %c0_23] : memref<2x1x32xf32, #tpu.memory_space<vmem>>, vector<1x1x32xf32>
    %32 = vector.shape_cast %31 : vector<1x1x32xf32> to vector<1x32xf32>
    %33 = vector.shape_cast %32 : vector<1x32xf32> to vector<1x1x32xf32>
    %34 = vector.broadcast %33 : vector<1x1x32xf32> to vector<2x1x32xf32>
    %35 = arith.addf %30, %34 : vector<2x1x32xf32>
    %36 = vector.broadcast %35 : vector<2x1x32xf32> to vector<2x8x32xf32>
    %37 = arith.addf %36, %28 : vector<2x8x32xf32>
    %cst_24 = arith.constant 0.000000e+00 : f32
    %38 = vector.broadcast %cst_24 : f32 to vector<2x8x32xf32>
    %39 = arith.maximumf %37, %38 : vector<2x8x32xf32>
    %40 = vector.shape_cast %39 : vector<2x8x32xf32> to vector<16x32xf32>
    %c0_25 = arith.constant 0 : index
    %c0_26 = arith.constant 0 : index
    %41 = vector.load %arg5[%c0_25, %c0_26] : memref<16x32xf32, #tpu.memory_space<vmem>>, vector<16x32xf32>
    tpu.vector_store %arg5[%c0_25, %c0_26], %40 {strides = array<i32>} : memref<16x32xf32, #tpu.memory_space<vmem>>, vector<16x32xf32>,
    return
  }
  func.func @transform_0(%arg0: i32) -> (i32, i32) {
    %c0_i32 = arith.constant 0 : i32
    %c0_i32_0 = arith.constant 0 : i32
    return %arg0, %c0_i32 : i32, i32
  }
  func.func @transform_1(%arg0: i32) -> (i32, i32, i32) {
    %c0_i32 = arith.constant 0 : i32
    %c0_i32_0 = arith.constant 0 : i32
    %c0_i32_1 = arith.constant 0 : i32
    %c0_i32_2 = arith.constant 0 : i32
    return %c0_i32, %c0_i32_0, %c0_i32_1 : i32, i32, i32
  }
  func.func @transform_2(%arg0: i32) -> (i32, i32, i32) {
    %c0_i32 = arith.constant 0 : i32
    %c0_i32_0 = arith.constant 0 : i32
    %c0_i32_1 = arith.constant 0 : i32
    %c0_i32_2 = arith.constant 0 : i32
    return %c0_i32, %c0_i32_0, %c0_i32_1 : i32, i32, i32
  }
  func.func @transform_3(%arg0: i32) -> (i32, i32, i32) {
    %c0_i32 = arith.constant 0 : i32
    %c0_i32_0 = arith.constant 0 : i32
    %c0_i32_1 = arith.constant 0 : i32
    %c0_i32_2 = arith.constant 0 : i32
    return %c0_i32, %c0_i32_0, %c0_i32_1 : i32, i32, i32
  }
  func.func @transform_4(%arg0: i32) -> (i32, i32) {
    %c0_i32 = arith.constant 0 : i32
    %c0_i32_0 = arith.constant 0 : i32
    return %arg0, %c0_i32 : i32, i32
  }
}

</mosaic_0001>

<bundles_post_ra>
// kernel: adaptive_prop_interaction.1
= control target key start
LH: loop header
LB: loop body
LE: loop exit
PB: predicated region body
PF: predicated region fallthrough
CT: control target
= control target key end

     0   :  { %vm23_vm0 = vcmask 261120   ;;  %s317_s1 = inlined_call_operand.vmem [shape: f32[2,32,32], index: 1, kind: input, shape index: {}]   ;;  %s318_s2 = inlined_call_operand.vmem [shape: f32[2,32,32], index: 2, kind: input, shape index: {}]   ;;  %s319_s0 = inlined_call_operand.vmem [shape: f32[16,32], index: 0, kind: input, shape index: {}, may-alias: {0,4}]   ;;  %s320_s3 = inlined_call_operand.vmem [shape: f32[2,1,32], index: 3, kind: input, shape index: {}]   ;;  %s321_s4 = inlined_call_operand.vmem [shape: f32[16,32], index: 4, kind: output, shape index: {}, may-alias: {0,4}]  }
   0x1   :  { %v22_v0 = vld [vmem:[%s317_s1 + $0x18] sm:$0xff]  ;;  %v21_v1 = vld [vmem:[%s317_s1 + $0x10] sm:$0xff]  ;;  %v20_v2 = vld [vmem:[%s317_s1 + $0x8] sm:$0xff] }
   0x2   :  { %42 = vmatpush.msra.mxu0 %v22_v0  ;;  %v56_v3 = vld [vmem:[%s318_s2 + $0x18] sm:$0xff]  ;;  %v55_v4 = vld [vmem:[%s318_s2 + $0x10] sm:$0xff]  ;;  %v19_v5 = vld [vmem:[%s317_s1] sm:$0xff] }
   0x3   :  { %69 = vmatpush.msra.mxu1 %v56_v3  ;;  %v54_v6 = vld [vmem:[%s318_s2 + $0x8] sm:$0xff]  ;;  %v17_v7 = vld [vmem:[%s319_s0] sm:$0xff]  ;;  %v202_v10 = vld [vmem:[%s317_s1 + $0x38] sm:$0xff] }
   0x4   :  { %43 = vmatpush.msra.mxu0 %v21_v1  ;;  %v53_v8 = vld [vmem:[%s318_s2] sm:$0xff]  ;;  %v18_v9 = vld [vmem:[%s319_s0 + $0x8] sm:$0xff]  ;;  %v208_v11 = vld [vmem:[%s318_s2 + $0x38] sm:$0xff]  ;;  %126 = vmatpush.msra.mxu2 %v202_v10 }
   0x5   :  { %70 = vmatpush.msra.mxu1 %v55_v4  ;;  %154 = vmatpush.msra.mxu3 %v208_v11  ;;  %v201_v12 = vld [vmem:[%s317_s1 + $0x30] sm:$0xff]  ;;  %v200_v14 = vld [vmem:[%s317_s1 + $0x28] sm:$0xff]  ;;  %v199_v16 = vld [vmem:[%s317_s1 + $0x20] sm:$0xff] }
   0x6   :  { %44 = vmatpush.msra.mxu0 %v20_v2  ;;  %v207_v13 = vld [vmem:[%s318_s2 + $0x30] sm:$0xff]  ;;  %127 = vmatpush.msra.mxu2 %v201_v12  ;;  %v206_v15 = vld [vmem:[%s318_s2 + $0x28] sm:$0xff]  ;;  %v205_v17 = vld [vmem:[%s318_s2 + $0x20] sm:$0xff] }
   0x7   :  { %71 = vmatpush.msra.mxu1 %v54_v6  ;;  %155 = vmatpush.msra.mxu3 %v207_v13  ;;  %v94_v28 = vld [vmem:[%s320_s3] sm:$0x1]  ;;  %v211_v55 = vld [vmem:[%s320_s3 + $0x1] sm:$0x1] }
   0x8   :  { %45 = vmatpush.msra.mxu0 %v19_v5  ;;  %128 = vmatpush.msra.mxu2 %v200_v14 }
   0x9   :  { %195 = vmatmul.msk.f32.vlgmr.msra.gmra.mxu0 %vm23_vm0, %v17_v7  ;;  %72 = vmatpush.msra.mxu1 %v53_v8 }
   0xa   :  { %197 = vmatmul.msk.f32.vlgmr.msra.gmra.mxu1 %vm23_vm0, %v17_v7  ;;  %156 = vmatpush.msra.mxu3 %v206_v15 }
   0xb   :  { %129 = vmatpush.msra.mxu2 %v199_v16 }
   0xc   :  { %157 = vmatpush.msra.mxu3 %v205_v17 }
  0x11   :  { %196 = vmatmul.msk.f32.gmra.mxu0 %vm23_vm0, %v18_v9 }
  0x12   :  { %198 = vmatmul.msk.f32.gmra.mxu1 %vm23_vm0, %v18_v9 }
  0x86   :  { %v47_v18 = vpop.f32.mrf.mxu0 }
  0x87   :  { %v80_v19 = vsel %vm23_vm0, %v47_v18, -inf  ;;  %v74_v31 = vpop.f32.mrf.mxu1 }
  0x88   :  { %v81_v20 = vrot.slane %v80_v19, 4 }
  0x8a   :  { %v82_v21 = vmax.f32 %v80_v19, %v81_v20 }
  0x8c   :  { %v83_v22 = vrot.slane %v82_v21, 2 }
  0x8e   :  { %v84_v23 = vmax.f32 %v82_v21, %v83_v22  ;;  %v50_v24 = vpop.f32.mrf.mxu0 }
  0x8f   :  { %v87_v25 = vsel %vm23_vm0, %v50_v24, -inf  ;;  %v77_v41 = vpop.f32.mrf.mxu1 }
  0x90   :  { %v85_v26 = vrot.slane %v84_v23, 1  ;;  %v88_v27 = vrot.slane %v87_v25, 4 }
  0x92   :  { %v89_v29 = vmax.f32 %v87_v25, %v88_v27  ;;  %v86_v30 = vmax.f32 %v84_v23, %v85_v26 }
  0x94   :  { %v90_v32 = vrot.slane %v89_v29, 2  ;;  %v95_v33 = vadd.f32 %v94_v28, %v86_v30 }
  0x96   :  { %v91_v34 = vmax.f32 %v89_v29, %v90_v32  ;;  %v97_v35 = vperm.slane %v95_v33, 0 }
  0x98   :  { %v92_v36 = vrot.slane %v91_v34, 1  ;;  %v99_v37 = vadd.f32 %v97_v35, %v74_v31 }
  0x9a   :  { %v101_v38 = vmax.f32 %v99_v37, 0.0  ;;  %v93_v39 = vmax.f32 %v91_v34, %v92_v36 }
  0x9c   :  { %203 = vmatmul.msk.f32.vlgmr.msra.gmra.mxu2 %vm23_vm0, %v101_v38  ;;  %209 = vmatmul.msk.f32.vlgmr.msra.gmra.mxu3 %vm23_vm0, %v101_v38  ;;  %v96_v40 = vadd.f32 %v94_v28, %v93_v39 }
  0x9e   :  { %v98_v42 = vperm.slane %v96_v40, 0 }
  0xa0   :  { %v100_v43 = vadd.f32 %v98_v42, %v77_v41 }
  0xa2   :  { %v102_v44 = vmax.f32 %v100_v43, 0.0 }
  0xa4   :  { %204 = vmatmul.msk.f32.gmra.mxu2 %vm23_vm0, %v102_v44  ;;  %210 = vmatmul.msk.f32.gmra.mxu3 %vm23_vm0, %v102_v44 }
 0x11f   :  { %v131_v45 = vpop.f32.mrf.mxu2  ;;  %v159_v60 = vpop.f32.mrf.mxu3 }
 0x120   :  { %v165_v46 = vsel %vm23_vm0, %v131_v45, -inf }
 0x121   :  { %v166_v47 = vrot.slane %v165_v46, 4 }
 0x123   :  { %v167_v48 = vmax.f32 %v165_v46, %v166_v47 }
 0x125   :  { %v168_v49 = vrot.slane %v167_v48, 2 }
 0x127   :  { %v169_v50 = vmax.f32 %v167_v48, %v168_v49  ;;  %v134_v51 = vpop.f32.mrf.mxu2  ;;  %v162_v5 = vpop.f32.mrf.mxu3 }
 0x128   :  { %v172_v52 = vsel %vm23_vm0, %v134_v51, -inf }
 0x129   :  { %v170_v53 = vrot.slane %v169_v50, 1  ;;  %v173_v54 = vrot.slane %v172_v52, 4 }
 0x12b   :  { %v171_v56 = vmax.f32 %v169_v50, %v170_v53  ;;  %v174_v57 = vmax.f32 %v172_v52, %v173_v54 }
 0x12d   :  { %v181_v58 = vadd.f32 %v211_v55, %v171_v56  ;;  %v175_v59 = vrot.slane %v174_v57, 2 }
 0x12f   :  { %v183_v61 = vperm.slane %v181_v58, 0  ;;  %v176_v62 = vmax.f32 %v174_v57, %v175_v59 }
 0x131   :  { %v185_v63 = vadd.f32 %v183_v61, %v159_v60  ;;  %v177_v0 = vrot.slane %v176_v62, 1 }
 0x133   :  { %v187_v1 = vmax.f32 %v185_v63, 0.0  ;;  %v178_v2 = vmax.f32 %v176_v62, %v177_v0 }
 0x135   :  { %189 = vst.msk [vmem:[%s321_s4] sm:$0xff] %vm23_vm0, %v187_v1  ;;  %v182_v3 = vadd.f32 %v211_v55, %v178_v2 }
 0x137   :  { %v184_v4 = vperm.slane %v182_v3, 0 }
 0x139   :  { %v186_v6 = vadd.f32 %v184_v4, %v162_v5 }
 0x13b   :  { %v188_v7 = vmax.f32 %v186_v6, 0.0 }
 0x13d   :  { %190 = vst.msk [vmem:[%s321_s4 + $0x8] sm:$0xff] %vm23_vm0, %v188_v7 }

</bundles_post_ra>
